<compile_context>
chip_gen: v5e
topology: v5e:2x2
jax: 0.10.0
libtpu: 0.0.40
codegen_flags: <defaults>
</compile_context>

<pallas_src>
import functools

import jax
import jax.numpy as jnp
from jax import lax
from jax.experimental import pallas as pl
from jax.experimental.pallas import tpu as pltpu

LANES = 128                         # lane width (vreg minor dim)
ROW_ALIGN = 8                       # sublane multiple
CHUNK = 256                         # rows per inner fori_loop chunk
TARGET_TILE_BYTES = 4 * 1024 * 1024  # ~4 MiB per input per grid step
MAX_TM = 16384                      # hard cap on rows per tile
NUM_CORES = 2                       # leading "parallel" grid axis (v7x / megacore)


def _metrics_kernel(med_ref, nv_ref, t_ref, p_ref, out_ref, acc_ref):
    """Accumulate lane-resident reduction partials for one (TM, 128) tile.

    med_ref : SMEM (1,) f32  scalar-prefetch: median threshold
    nv_ref  : SMEM (1,) i32  scalar-prefetch: number of valid elements
    t_ref   : VMEM (TM, 128) y_true tile (f32 or bf16)
    p_ref   : VMEM (TM, 128) y_pred tile (f32 or bf16)
    out_ref : VMEM (1, 8, 128) f32 output block (one per core, resident over i)
    acc_ref : VMEM (8, 128) f32 scratch accumulator (persists across grid steps)
    """
    c = pl.program_id(0)
    i = pl.program_id(1)
    steps = pl.num_programs(1)
    tm = t_ref.shape[0]
    chunk = min(CHUNK, tm)          # tm is a multiple of chunk by construction
    n_chunks = tm // chunk

    med = med_ref[0]
    nv = nv_ref[0]

    # Logical tile index & flat element base -> is this tile fully valid?
    # (Physical block index is clamped in the index_map; correctness for
    #  tail / duplicate tiles comes from the masked path below.)
    tile = c * steps + i
    base = tile * (tm * LANES)
    interior = (base + tm * LANES) <= nv

    @pl.when(i == 0)
    def _():
        acc_ref[...] = jnp.zeros_like(acc_ref)

    def partial_sums(masked):
        """Inner chunked loop; returns seven (1,128) lane-column partials."""
        if masked:
            # 0..chunk*128-1 flat offsets within a chunk (hoisted out of loop).
            local_flat = (
                lax.broadcasted_iota(jnp.int32, (chunk, LANES), 0) * LANES
                + lax.broadcasted_iota(jnp.int32, (chunk, LANES), 1))

        def body(j, carry):
            s_dsq, s_dab, s_t, s_t2, s_tp, s_gt, s_pb = carry
            r0 = pl.multiple_of(j * chunk, chunk)
            t = t_ref[pl.ds(r0, chunk), :].astype(jnp.float32)
            p = p_ref[pl.ds(r0, chunk), :].astype(jnp.float32)

            d = t - p
            dsq = d * d
            dab = jnp.abs(d)
            tv = t
            t2 = t * t
            gt = (t > med).astype(jnp.float32)
            pb = (p > med).astype(jnp.float32)

            if masked:
                # jnp.where (not mask-multiply) so NaN/Inf garbage in padded /
                # out-of-range regions cannot poison the sums.
                limit = nv - base - r0 * LANES
                valid = local_flat < limit
                dsq = jnp.where(valid, dsq, 0.0)
                dab = jnp.where(valid, dab, 0.0)
                tv = jnp.where(valid, tv, 0.0)
                t2 = jnp.where(valid, t2, 0.0)
                gt = jnp.where(valid, gt, 0.0)
                pb = jnp.where(valid, pb, 0.0)

            tp = gt * pb

            # Sublane-only reductions; cross-lane reduction is deferred to the
            # JAX glue on the tiny (NUM_CORES, 8, 128) output.
            return (s_dsq + jnp.sum(dsq, axis=0, keepdims=True),
                    s_dab + jnp.sum(dab, axis=0, keepdims=True),
                    s_t + jnp.sum(tv, axis=0, keepdims=True),
                    s_t2 + jnp.sum(t2, axis=0, keepdims=True),
                    s_tp + jnp.sum(tp, axis=0, keepdims=True),
                    s_gt + jnp.sum(gt, axis=0, keepdims=True),
                    s_pb + jnp.sum(pb, axis=0, keepdims=True))

        init = tuple(jnp.zeros((1, LANES), jnp.float32) for _ in range(7))
        return lax.fori_loop(0, n_chunks, body, init)

    def commit(sums):
        # Assembled ONCE per grid step (not per chunk); 8th row keeps the
        # accumulator a full (8,128) sublane tile.
        upd = jnp.concatenate(
            list(sums) + [jnp.zeros((1, LANES), jnp.float32)], axis=0)
        acc_ref[...] += upd

    @pl.when(interior)
    def _():
        commit(partial_sums(masked=False))

    @pl.when(jnp.logical_not(interior))
    def _():
        commit(partial_sums(masked=True))

    @pl.when(i == steps - 1)
    def _():
        out_ref[0, :, :] = acc_ref[...]


@functools.partial(jax.jit, static_argnames=("tm",))
def _run_sums(median, n_valid, t2d, p2d, *, tm):
    rows = t2d.shape[0]
    n_elems = rows * LANES
    total_tiles = pl.cdiv(rows, tm)
    steps = pl.cdiv(total_tiles, NUM_CORES)

    def in_map(c, i, med, nv):
        # Clamp the physical block index; logical masking in-kernel keeps the
        # clamped duplicate / tail tiles correct (they contribute zero).
        return (jnp.minimum(c * steps + i, total_tiles - 1), 0)

    def out_map(c, i, med, nv):
        return (c, 0, 0)

    itemsize = jnp.dtype(t2d.dtype).itemsize
    tile_bytes = tm * LANES * itemsize
    # 2 inputs x 2 pipeline buffers x tile + headroom; stays under v7x's 64 MiB.
    vmem_limit = int(min(100 << 20, 4 * tile_bytes + (16 << 20)))

    cost = pl.CostEstimate(
        flops=16 * n_elems,
        transcendentals=0,
        bytes_accessed=int(2 * n_elems * itemsize + NUM_CORES * 8 * LANES * 4),
    )

    partials = pl.pallas_call(
        _metrics_kernel,
        out_shape=jax.ShapeDtypeStruct((NUM_CORES, 8, LANES), jnp.float32),
        grid_spec=pltpu.PrefetchScalarGridSpec(
            num_scalar_prefetch=2,
            grid=(NUM_CORES, steps),
            in_specs=[
                pl.BlockSpec((tm, LANES), in_map),
                pl.BlockSpec((tm, LANES), in_map),
            ],
            out_specs=pl.BlockSpec((1, 8, LANES), out_map),
            scratch_shapes=[pltpu.VMEM((8, LANES), jnp.float32)],
        ),
        compiler_params=pltpu.CompilerParams(
            dimension_semantics=("parallel", "arbitrary"),
            vmem_limit_bytes=vmem_limit),
        cost_estimate=cost,
    )(median, n_valid, t2d, p2d)

    # Final (cheap) cross-core + cross-lane reduction of the tiny partials.
    return jnp.sum(partials, axis=(0, 2))


def metrics_calculator(y_true, y_pred, median_value,
                       types=("MSE", "RMSE", "MAE", "R^2", "Accuracy")):
    """JAX/Pallas equivalent of MetricsCalculator_nntorch.forward."""
    y_true = jnp.asarray(y_true)
    y_pred = jnp.asarray(y_pred)

    # Keep bf16/f32 native (halves HBM bytes for bf16); other dtypes -> f32.
    def _native(x):
        return x if x.dtype in (jnp.dtype(jnp.float32), jnp.dtype(jnp.bfloat16)) \
            else x.astype(jnp.float32)
    y_true = _native(y_true)
    y_pred = _native(y_pred)

    n = int(y_true.size)  # NOTE: n == 0 divides by zero, like the torch module.
    flat_t = y_true.reshape(-1)
    flat_p = y_pred.reshape(-1)

    # Pad only to a multiple of 8*128 elements, and only when needed (common
    # NCHW sizes are already aligned -> zero-copy). Tail is masked in-kernel.
    align = ROW_ALIGN * LANES
    pad = (-n) % align
    if pad:
        flat_t = jnp.pad(flat_t, (0, pad))
        flat_p = jnp.pad(flat_p, (0, pad))
    t2d = flat_t.reshape(-1, LANES)
    p2d = flat_p.reshape(-1, LANES)
    rows = t2d.shape[0]

    # Tile rows: target ~4 MiB per input per grid step, multiple of CHUNK.
    itemsize = jnp.dtype(t2d.dtype).itemsize
    tm_target = min(MAX_TM, max(CHUNK, TARGET_TILE_BYTES // (LANES * itemsize)))
    if rows >= tm_target:
        tm = tm_target
    elif rows >= CHUNK:
        tm = (rows // CHUNK) * CHUNK
    else:
        tm = rows  # rows is a multiple of 8

    median = jnp.asarray([median_value], jnp.float32)
    n_valid = jnp.asarray([n], jnp.int32)

    s = _run_sums(median, n_valid, t2d, p2d, tm=tm)
    sum_sq, sum_abs, sum_t, sum_t2, tp, sum_gt, sum_pb, _ = [s[k] for k in range(8)]
    nf = jnp.float32(n)

    results = {}
    if "MSE" in types:
        results["MSE"] = sum_sq / nf
    if "RMSE" in types:
        results["RMSE"] = jnp.sqrt(sum_sq / nf)
    if "MAE" in types:
        results["MAE"] = sum_abs / nf
    if "R^2" in types:
        # NOTE: one-pass variance formula; for huge N with large non-zero mean
        # this can lose precision vs. a two-pass sum((t - mean)^2), and a
        # constant y_true gives inf/nan (same as the torch module's 0-division).
        mean_t = sum_t / nf
        ss_total = sum_t2 - nf * mean_t * mean_t
        results["R^2"] = 1.0 - sum_sq / ss_total
    if "Accuracy" in types:
        # Torch module *replaces* the results dict when 'Accuracy' is requested.
        fp = sum_pb - tp
        fn = sum_gt - tp
        tn = nf - sum_gt - sum_pb + tp

        def _safe_div(num, den):
            # torchmetrics zero-division convention: return 0 when denom is 0.
            return jnp.where(den == 0, 0.0, num / jnp.where(den == 0, 1.0, den))

        accuracy = (tp + tn) / nf
        precision = _safe_div(tp, tp + fp)
        recall = _safe_div(tp, tp + fn)            # sensitivity
        specificity = _safe_div(tn, tn + fp)
        f1 = _safe_div(2.0 * precision * recall, precision + recall)
        # TODO(synk): AUROC / AUPRC need a global sort of y_pred (torchmetrics
        # ranking metrics) — no clean Pallas single-pass equivalent, omitted.
        results = {
            "Accuracy": accuracy,
            "Sensitivity": recall,
            "Specificity": specificity,
            "Precision": precision,
            "F1": f1,
        }
    return results


def _reference(y_true, y_pred, median_value):
    """Pure-JAX reference for sanity checking."""
    t = jnp.asarray(y_true, jnp.float32).reshape(-1)
    p = jnp.asarray(y_pred, jnp.float32).reshape(-1)
    mse = jnp.mean((t - p) ** 2)
    mae = jnp.mean(jnp.abs(t - p))
    r2 = 1.0 - jnp.sum((t - p) ** 2) / jnp.sum((t - jnp.mean(t)) ** 2)
    gt = t > median_value
    pb = p > median_value
    tp = jnp.sum(gt & pb).astype(jnp.float32)
    fp = jnp.sum(~gt & pb).astype(jnp.float32)
    fn = jnp.sum(gt & ~pb).astype(jnp.float32)
    tn = jnp.sum(~gt & ~pb).astype(jnp.float32)
    acc = (tp + tn) / t.size
    prec = tp / (tp + fp)
    rec = tp / (tp + fn)
    f1 = 2 * prec * rec / (prec + rec)
    return {"MSE": mse, "RMSE": jnp.sqrt(mse), "MAE": mae, "R^2": r2,
            "Accuracy": acc, "Precision": prec, "Sensitivity": rec, "F1": f1}


def _assert_close(name, a, b, rtol=1e-4, atol=1e-5):
    a = float(a)
    b = float(b)
    assert abs(a - b) <= atol + rtol * abs(b), f"{name}: got {a}, want {b}"


if __name__ == "__main__":
    key = jax.random.PRNGKey(0)
    k1, k2, k3, k4, k5, k6 = jax.random.split(key, 6)

    # --- aligned NCHW case (B=2, C=4, H=W=16) -------------------------------
    y_true = jax.random.normal(k1, (2, 4, 16, 16), dtype=jnp.float32)
    y_pred = y_true + 0.1 * jax.random.normal(k2, (2, 4, 16, 16),
                                              dtype=jnp.float32)
    median_value = 0.0

    reg = metrics_calculator(y_true, y_pred, median_value,
                             types=("MSE", "RMSE", "MAE", "R^2"))
    cls = metrics_calculator(y_true, y_pred, median_value,
                             types=("Accuracy",))
    jax.block_until_ready(reg)
    jax.block_until_ready(cls)

    ref = _reference(y_true, y_pred, median_value)
    _assert_close("MSE", reg["MSE"], ref["MSE"])
    _assert_close("RMSE", reg["RMSE"], ref["RMSE"])
    _assert_close("MAE", reg["MAE"], ref["MAE"])
    _assert_close("R^2", reg["R^2"], ref["R^2"], rtol=1e-4, atol=1e-4)
    _assert_close("Accuracy", cls["Accuracy"], ref["Accuracy"])
    _assert_close("Precision", cls["Precision"], ref["Precision"])
    _assert_close("Sensitivity", cls["Sensitivity"], ref["Sensitivity"])
    _assert_close("F1", cls["F1"], ref["F1"])

    # --- ragged / unaligned case (exercises in-kernel tail masking) ---------
    y_true2 = jax.random.normal(k3, (3, 5, 7, 11), dtype=jnp.float32)
    y_pred2 = y_true2 + 0.2 * jax.random.normal(k4, (3, 5, 7, 11),
                                                dtype=jnp.float32)
    reg2 = metrics_calculator(y_true2, y_pred2, 0.1, types=("MSE", "MAE", "R^2"))
    cls2 = metrics_calculator(y_true2, y_pred2, 0.1, types=("Accuracy",))
    jax.block_until_ready(reg2)
    jax.block_until_ready(cls2)
    ref2 = _reference(y_true2, y_pred2, 0.1)
    _assert_close("MSE2", reg2["MSE"], ref2["MSE"])
    _assert_close("MAE2", reg2["MAE"], ref2["MAE"])
    _assert_close("R^2 2", reg2["R^2"], ref2["R^2"], rtol=1e-4, atol=1e-4)
    _assert_close("Accuracy2", cls2["Accuracy"], ref2["Accuracy"])

    # --- larger aligned case (exercises multi-chunk inner loop, f32 & bf16) --
    y_true3 = jax.random.normal(k5, (2, 8, 64, 64), dtype=jnp.float32)
    y_pred3 = y_true3 + 0.2 * jax.random.normal(k6, (2, 8, 64, 64),
                                                dtype=jnp.float32)
    reg3 = metrics_calculator(y_true3, y_pred3, 0.0,
                              types=("MSE", "RMSE", "MAE", "R^2"))
    cls3 = metrics_calculator(y_true3, y_pred3, 0.0, types=("Accuracy",))
    jax.block_until_ready(reg3)
    jax.block_until_ready(cls3)
    ref3 = _reference(y_true3, y_pred3, 0.0)
    _assert_close("MSE3", reg3["MSE"], ref3["MSE"])
    _assert_close("MAE3", reg3["MAE"], ref3["MAE"])
    _assert_close("R^2 3", reg3["R^2"], ref3["R^2"], rtol=1e-4, atol=1e-4)
    _assert_close("Accuracy3", cls3["Accuracy"], ref3["Accuracy"])
    _assert_close("F1 3", cls3["F1"], ref3["F1"])

    yt_bf = y_true3.astype(jnp.bfloat16)
    yp_bf = y_pred3.astype(jnp.bfloat16)
    reg_bf = metrics_calculator(yt_bf, yp_bf, 0.0, types=("MSE", "MAE"))
    jax.block_until_ready(reg_bf)
    ref_bf = _reference(yt_bf, yp_bf, 0.0)
    _assert_close("MSE bf16", reg_bf["MSE"], ref_bf["MSE"], rtol=1e-3, atol=1e-4)
    _assert_close("MAE bf16", reg_bf["MAE"], ref_bf["MAE"], rtol=1e-3, atol=1e-4)

    print("KERNEL_OK")
</pallas_src>

<mosaic_0001>
module attributes {stable_mosaic.version = 11 : i64} {
  func.func @_metrics_kernel(%arg0: i32, %arg1: i32, %arg2: memref<1xf32, #tpu.memory_space<smem>>, %arg3: memref<1xi32, #tpu.memory_space<smem>>, %arg4: memref<16x128xf32, #tpu.memory_space<vmem>>, %arg5: memref<16x128xf32, #tpu.memory_space<vmem>>, %arg6: memref<1x8x128xf32, #tpu.memory_space<vmem>>, %arg7: memref<8x128xf32, #tpu.memory_space<vmem>>) attributes {dimension_semantics = [#tpu.dimension_semantics<parallel>, #tpu.dimension_semantics<arbitrary>], iteration_bounds = array<i64: 2, 1>, scalar_prefetch = 2 : i64, scratch_operands = 1 : i64, tpu.core_type = #tpu.core_type<tc>, window_params = [{transform_indices = @transform_0, window_bounds = array<i64: 16, 128>}, {transform_indices = @transform_1, window_bounds = array<i64: 16, 128>}, {transform_indices = @transform_2, window_bounds = array<i64: 1, 8, 128>}]} {
    %c0 = arith.constant 0 : index
    %0 = memref.load %arg2[%c0] : memref<1xf32, #tpu.memory_space<smem>>
    %c0_0 = arith.constant 0 : index
    %1 = memref.load %arg3[%c0_0] : memref<1xi32, #tpu.memory_space<smem>>
    %c1_i32 = arith.constant 1 : i32
    %2 = arith.muli %arg0, %c1_i32 : i32
    %3 = arith.addi %2, %arg1 : i32
    %c2048_i32 = arith.constant 2048 : i32
    %4 = arith.muli %3, %c2048_i32 : i32
    %c2048_i32_1 = arith.constant 2048 : i32
    %5 = arith.addi %4, %c2048_i32_1 : i32
    %6 = arith.cmpi sle, %5, %1 : i32
    %c0_i32 = arith.constant 0 : i32
    %7 = arith.cmpi eq, %arg1, %c0_i32 : i32
    %8 = arith.extui %7 : i1 to i32
    %c0_i32_2 = arith.constant 0 : i32
    %9 = arith.cmpi ne, %8, %c0_i32_2 : i32
    scf.if %9 {
      %cst = arith.constant 0.000000e+00 : f32
      %18 = vector.broadcast %cst : f32 to vector<8x128xf32>
      %c0_7 = arith.constant 0 : index
      %c0_8 = arith.constant 0 : index
      %19 = vector.load %arg7[%c0_7, %c0_8] : memref<8x128xf32, #tpu.memory_space<vmem>>, vector<8x128xf32>
      tpu.vector_store %arg7[%c0_7, %c0_8], %18 {strides = array<i32>} : memref<8x128xf32, #tpu.memory_space<vmem>>, vector<8x128xf32>,
    } else {
    }
    %10 = arith.extui %6 : i1 to i32
    %c0_i32_3 = arith.constant 0 : i32
    %11 = arith.cmpi ne, %10, %c0_i32_3 : i32
    scf.if %11 {
      %cst = arith.constant 0.000000e+00 : f32
      %18 = vector.broadcast %cst : f32 to vector<1x128xf32>
      %cst_7 = arith.constant 0.000000e+00 : f32
      %19 = vector.broadcast %cst_7 : f32 to vector<1x128xf32>
      %cst_8 = arith.constant 0.000000e+00 : f32
      %20 = vector.broadcast %cst_8 : f32 to vector<1x128xf32>
      %cst_9 = arith.constant 0.000000e+00 : f32
      %21 = vector.broadcast %cst_9 : f32 to vector<1x128xf32>
      %cst_10 = arith.constant 0.000000e+00 : f32
      %22 = vector.broadcast %cst_10 : f32 to vector<1x128xf32>
      %cst_11 = arith.constant 0.000000e+00 : f32
      %23 = vector.broadcast %cst_11 : f32 to vector<1x128xf32>
      %cst_12 = arith.constant 0.000000e+00 : f32
      %24 = vector.broadcast %cst_12 : f32 to vector<1x128xf32>
      %c0_i32_13 = arith.constant 0 : i32
      %c16_i32 = arith.constant 16 : i32
      %25 = arith.muli %c0_i32_13, %c16_i32 : i32
      %26 = tpu.assume_multiple %25, 16 : i32
      %27 = arith.index_cast %26 : i32 to index
      %c0_14 = arith.constant 0 : index
      %28 = vector.load %arg4[%27, %c0_14] : memref<16x128xf32, #tpu.memory_space<vmem>>, vector<16x128xf32>
      %29 = arith.index_cast %26 : i32 to index
      %c0_15 = arith.constant 0 : index
      %30 = vector.load %arg5[%29, %c0_15] : memref<16x128xf32, #tpu.memory_space<vmem>>, vector<16x128xf32>
      %31 = arith.subf %28, %30 : vector<16x128xf32>
      %32 = arith.mulf %31, %31 : vector<16x128xf32>
      %33 = math.absf %31 : vector<16x128xf32>
      %34 = arith.mulf %28, %28 : vector<16x128xf32>
      %35 = vector.broadcast %0 : f32 to vector<16x128xf32>
      %36 = arith.cmpf ogt, %28, %35 : vector<16x128xf32>
      %37 = arith.extui %36 : vector<16x128xi1> to vector<16x128xi32>
      %38 = arith.sitofp %37 : vector<16x128xi32> to vector<16x128xf32>
      %39 = vector.broadcast %0 : f32 to vector<16x128xf32>
      %40 = arith.cmpf ogt, %30, %39 : vector<16x128xf32>
      %41 = arith.extui %40 : vector<16x128xi1> to vector<16x128xi32>
      %42 = arith.sitofp %41 : vector<16x128xi32> to vector<16x128xf32>
      %43 = arith.mulf %38, %42 : vector<16x128xf32>
      %cst_16 = arith.constant dense<0.000000e+00> : vector<128xf32>
      %44 = vector.multi_reduction <add>, %32, %cst_16 [0] : vector<16x128xf32> to vector<128xf32>
      %45 = vector.shape_cast %44 : vector<128xf32> to vector<1x128xf32>
      %46 = arith.addf %18, %45 : vector<1x128xf32>
      %cst_17 = arith.constant dense<0.000000e+00> : vector<128xf32>
      %47 = vector.multi_reduction <add>, %33, %cst_17 [0] : vector<16x128xf32> to vector<128xf32>
      %48 = vector.shape_cast %47 : vector<128xf32> to vector<1x128xf32>
      %49 = arith.addf %19, %48 : vector<1x128xf32>
      %cst_18 = arith.constant dense<0.000000e+00> : vector<128xf32>
      %50 = vector.multi_reduction <add>, %28, %cst_18 [0] : vector<16x128xf32> to vector<128xf32>
      %51 = vector.shape_cast %50 : vector<128xf32> to vector<1x128xf32>
      %52 = arith.addf %20, %51 : vector<1x128xf32>
      %cst_19 = arith.constant dense<0.000000e+00> : vector<128xf32>
      %53 = vector.multi_reduction <add>, %34, %cst_19 [0] : vector<16x128xf32> to vector<128xf32>
      %54 = vector.shape_cast %53 : vector<128xf32> to vector<1x128xf32>
      %55 = arith.addf %21, %54 : vector<1x128xf32>
      %cst_20 = arith.constant dense<0.000000e+00> : vector<128xf32>
      %56 = vector.multi_reduction <add>, %43, %cst_20 [0] : vector<16x128xf32> to vector<128xf32>
      %57 = vector.shape_cast %56 : vector<128xf32> to vector<1x128xf32>
      %58 = arith.addf %22, %57 : vector<1x128xf32>
      %cst_21 = arith.constant dense<0.000000e+00> : vector<128xf32>
      %59 = vector.multi_reduction <add>, %38, %cst_21 [0] : vector<16x128xf32> to vector<128xf32>
      %60 = vector.shape_cast %59 : vector<128xf32> to vector<1x128xf32>
      %61 = arith.addf %23, %60 : vector<1x128xf32>
      %cst_22 = arith.constant dense<0.000000e+00> : vector<128xf32>
      %62 = vector.multi_reduction <add>, %42, %cst_22 [0] : vector<16x128xf32> to vector<128xf32>
      %63 = vector.shape_cast %62 : vector<128xf32> to vector<1x128xf32>
      %64 = arith.addf %24, %63 : vector<1x128xf32>
      %c1_i32_23 = arith.constant 1 : i32
      %cst_24 = arith.constant 0.000000e+00 : f32
      %65 = vector.broadcast %cst_24 : f32 to vector<1x128xf32>
      %66 = tpu.concatenate %46, %49, %52, %55, %58, %61, %64, %65 in 0 : vector<1x128xf32>, vector<1x128xf32>, vector<1x128xf32>, vector<1x128xf32>, vector<1x128xf32>, vector<1x128xf32>, vector<1x128xf32>, vector<1x128xf32> -> vector<8x128xf32>
      %c0_25 = arith.constant 0 : index
      %c0_26 = arith.constant 0 : index
      %67 = vector.load %arg7[%c0_25, %c0_26] : memref<8x128xf32, #tpu.memory_space<vmem>>, vector<8x128xf32>
      %68 = arith.addf %67, %66 : vector<8x128xf32>
      %c0_27 = arith.constant 0 : index
      %c0_28 = arith.constant 0 : index
      %69 = vector.load %arg7[%c0_27, %c0_28] : memref<8x128xf32, #tpu.memory_space<vmem>>, vector<8x128xf32>
      tpu.vector_store %arg7[%c0_27, %c0_28], %68 {strides = array<i32>} : memref<8x128xf32, #tpu.memory_space<vmem>>, vector<8x128xf32>,
    } else {
    }
    %true = arith.constant true
    %12 = arith.xori %6, %true : i1
    %13 = arith.extui %12 : i1 to i32
    %c0_i32_4 = arith.constant 0 : i32
    %14 = arith.cmpi ne, %13, %c0_i32_4 : i32
    scf.if %14 {
      %18 = tpu.iota {dimensions = array<i32: 0>} : vector<16x128xi32>
      %c128_i32 = arith.constant 128 : i32
      %19 = vector.broadcast %c128_i32 : i32 to vector<16x128xi32>
      %20 = arith.muli %18, %19 : vector<16x128xi32>
      %21 = tpu.iota {dimensions = array<i32: 1>} : vector<16x128xi32>
      %22 = arith.addi %20, %21 : vector<16x128xi32>
      %cst = arith.constant 0.000000e+00 : f32
      %23 = vector.broadcast %cst : f32 to vector<1x128xf32>
      %cst_7 = arith.constant 0.000000e+00 : f32
      %24 = vector.broadcast %cst_7 : f32 to vector<1x128xf32>
      %cst_8 = arith.constant 0.000000e+00 : f32
      %25 = vector.broadcast %cst_8 : f32 to vector<1x128xf32>
      %cst_9 = arith.constant 0.000000e+00 : f32
      %26 = vector.broadcast %cst_9 : f32 to vector<1x128xf32>
      %cst_10 = arith.constant 0.000000e+00 : f32
      %27 = vector.broadcast %cst_10 : f32 to vector<1x128xf32>
      %cst_11 = arith.constant 0.000000e+00 : f32
      %28 = vector.broadcast %cst_11 : f32 to vector<1x128xf32>
      %cst_12 = arith.constant 0.000000e+00 : f32
      %29 = vector.broadcast %cst_12 : f32 to vector<1x128xf32>
      %c0_i32_13 = arith.constant 0 : i32
      %c16_i32 = arith.constant 16 : i32
      %30 = arith.muli %c0_i32_13, %c16_i32 : i32
      %31 = tpu.assume_multiple %30, 16 : i32
      %32 = arith.index_cast %31 : i32 to index
      %c0_14 = arith.constant 0 : index
      %33 = vector.load %arg4[%32, %c0_14] : memref<16x128xf32, #tpu.memory_space<vmem>>, vector<16x128xf32>
      %34 = arith.index_cast %31 : i32 to index
      %c0_15 = arith.constant 0 : index
      %35 = vector.load %arg5[%34, %c0_15] : memref<16x128xf32, #tpu.memory_space<vmem>>, vector<16x128xf32>
      %36 = arith.subf %33, %35 : vector<16x128xf32>
      %37 = arith.mulf %36, %36 : vector<16x128xf32>
      %38 = math.absf %36 : vector<16x128xf32>
      %39 = arith.mulf %33, %33 : vector<16x128xf32>
      %40 = vector.broadcast %0 : f32 to vector<16x128xf32>
      %41 = arith.cmpf ogt, %33, %40 : vector<16x128xf32>
      %42 = arith.extui %41 : vector<16x128xi1> to vector<16x128xi32>
      %43 = arith.sitofp %42 : vector<16x128xi32> to vector<16x128xf32>
      %44 = vector.broadcast %0 : f32 to vector<16x128xf32>
      %45 = arith.cmpf ogt, %35, %44 : vector<16x128xf32>
      %46 = arith.extui %45 : vector<16x128xi1> to vector<16x128xi32>
      %47 = arith.sitofp %46 : vector<16x128xi32> to vector<16x128xf32>
      %48 = arith.subi %1, %4 : i32
      %c128_i32_16 = arith.constant 128 : i32
      %49 = arith.muli %31, %c128_i32_16 : i32
      %50 = arith.subi %48, %49 : i32
      %51 = vector.broadcast %50 : i32 to vector<16x128xi32>
      %52 = arith.cmpi slt, %22, %51 : vector<16x128xi32>
      %cst_17 = arith.constant 0.000000e+00 : f32
      %53 = vector.broadcast %cst_17 : f32 to vector<16x128xf32>
      %54 = arith.select %52, %37, %53 : vector<16x128xi1>, vector<16x128xf32>
      %cst_18 = arith.constant 0.000000e+00 : f32
      %55 = vector.broadcast %cst_18 : f32 to vector<16x128xf32>
      %56 = arith.select %52, %38, %55 : vector<16x128xi1>, vector<16x128xf32>
      %cst_19 = arith.constant 0.000000e+00 : f32
      %57 = vector.broadcast %cst_19 : f32 to vector<16x128xf32>
      %58 = arith.select %52, %33, %57 : vector<16x128xi1>, vector<16x128xf32>
      %cst_20 = arith.constant 0.000000e+00 : f32
      %59 = vector.broadcast %cst_20 : f32 to vector<16x128xf32>
      %60 = arith.select %52, %39, %59 : vector<16x128xi1>, vector<16x128xf32>
      %cst_21 = arith.constant 0.000000e+00 : f32
      %61 = vector.broadcast %cst_21 : f32 to vector<16x128xf32>
      %62 = arith.select %52, %43, %61 : vector<16x128xi1>, vector<16x128xf32>
      %cst_22 = arith.constant 0.000000e+00 : f32
      %63 = vector.broadcast %cst_22 : f32 to vector<16x128xf32>
      %64 = arith.select %52, %47, %63 : vector<16x128xi1>, vector<16x128xf32>
      %65 = arith.mulf %62, %64 : vector<16x128xf32>
      %cst_23 = arith.constant dense<0.000000e+00> : vector<128xf32>
      %66 = vector.multi_reduction <add>, %54, %cst_23 [0] : vector<16x128xf32> to vector<128xf32>
      %67 = vector.shape_cast %66 : vector<128xf32> to vector<1x128xf32>
      %68 = arith.addf %23, %67 : vector<1x128xf32>
      %cst_24 = arith.constant dense<0.000000e+00> : vector<128xf32>
      %69 = vector.multi_reduction <add>, %56, %cst_24 [0] : vector<16x128xf32> to vector<128xf32>
      %70 = vector.shape_cast %69 : vector<128xf32> to vector<1x128xf32>
      %71 = arith.addf %24, %70 : vector<1x128xf32>
      %cst_25 = arith.constant dense<0.000000e+00> : vector<128xf32>
      %72 = vector.multi_reduction <add>, %58, %cst_25 [0] : vector<16x128xf32> to vector<128xf32>
      %73 = vector.shape_cast %72 : vector<128xf32> to vector<1x128xf32>
      %74 = arith.addf %25, %73 : vector<1x128xf32>
      %cst_26 = arith.constant dense<0.000000e+00> : vector<128xf32>
      %75 = vector.multi_reduction <add>, %60, %cst_26 [0] : vector<16x128xf32> to vector<128xf32>
      %76 = vector.shape_cast %75 : vector<128xf32> to vector<1x128xf32>
      %77 = arith.addf %26, %76 : vector<1x128xf32>
      %cst_27 = arith.constant dense<0.000000e+00> : vector<128xf32>
      %78 = vector.multi_reduction <add>, %65, %cst_27 [0] : vector<16x128xf32> to vector<128xf32>
      %79 = vector.shape_cast %78 : vector<128xf32> to vector<1x128xf32>
      %80 = arith.addf %27, %79 : vector<1x128xf32>
      %cst_28 = arith.constant dense<0.000000e+00> : vector<128xf32>
      %81 = vector.multi_reduction <add>, %62, %cst_28 [0] : vector<16x128xf32> to vector<128xf32>
      %82 = vector.shape_cast %81 : vector<128xf32> to vector<1x128xf32>
      %83 = arith.addf %28, %82 : vector<1x128xf32>
      %cst_29 = arith.constant dense<0.000000e+00> : vector<128xf32>
      %84 = vector.multi_reduction <add>, %64, %cst_29 [0] : vector<16x128xf32> to vector<128xf32>
      %85 = vector.shape_cast %84 : vector<128xf32> to vector<1x128xf32>
      %86 = arith.addf %29, %85 : vector<1x128xf32>
      %c1_i32_30 = arith.constant 1 : i32
      %cst_31 = arith.constant 0.000000e+00 : f32
      %87 = vector.broadcast %cst_31 : f32 to vector<1x128xf32>
      %88 = tpu.concatenate %68, %71, %74, %77, %80, %83, %86, %87 in 0 : vector<1x128xf32>, vector<1x128xf32>, vector<1x128xf32>, vector<1x128xf32>, vector<1x128xf32>, vector<1x128xf32>, vector<1x128xf32>, vector<1x128xf32> -> vector<8x128xf32>
      %c0_32 = arith.constant 0 : index
      %c0_33 = arith.constant 0 : index
      %89 = vector.load %arg7[%c0_32, %c0_33] : memref<8x128xf32, #tpu.memory_space<vmem>>, vector<8x128xf32>
      %90 = arith.addf %89, %88 : vector<8x128xf32>
      %c0_34 = arith.constant 0 : index
      %c0_35 = arith.constant 0 : index
      %91 = vector.load %arg7[%c0_34, %c0_35] : memref<8x128xf32, #tpu.memory_space<vmem>>, vector<8x128xf32>
      tpu.vector_store %arg7[%c0_34, %c0_35], %90 {strides = array<i32>} : memref<8x128xf32, #tpu.memory_space<vmem>>, vector<8x128xf32>,
    } else {
    }
    %c0_i32_5 = arith.constant 0 : i32
    %15 = arith.cmpi eq, %arg1, %c0_i32_5 : i32
    %16 = arith.extui %15 : i1 to i32
    %c0_i32_6 = arith.constant 0 : i32
    %17 = arith.cmpi ne, %16, %c0_i32_6 : i32
    scf.if %17 {
      %c0_7 = arith.constant 0 : index
      %c0_8 = arith.constant 0 : index
      %18 = vector.load %arg7[%c0_7, %c0_8] : memref<8x128xf32, #tpu.memory_space<vmem>>, vector<8x128xf32>
      %c0_9 = arith.constant 0 : index
      %c0_10 = arith.constant 0 : index
      %c0_11 = arith.constant 0 : index
      %19 = vector.load %arg6[%c0_9, %c0_10, %c0_11] : memref<1x8x128xf32, #tpu.memory_space<vmem>>, vector<1x8x128xf32>
      %20 = vector.shape_cast %19 : vector<1x8x128xf32> to vector<8x128xf32>
      %21 = vector.shape_cast %18 : vector<8x128xf32> to vector<1x8x128xf32>
      tpu.vector_store %arg6[%c0_9, %c0_10, %c0_11], %21 {strides = array<i32>} : memref<1x8x128xf32, #tpu.memory_space<vmem>>, vector<1x8x128xf32>,
    } else {
    }
    return
  }
  func.func @transform_0(%arg0: i32, %arg1: i32, %arg2: memref<1xf32, #tpu.memory_space<smem>>, %arg3: memref<1xi32, #tpu.memory_space<smem>>) -> (i32, i32) {
    %c1_i32 = arith.constant 1 : i32
    %0 = arith.muli %arg0, %c1_i32 : i32
    %1 = arith.addi %0, %arg1 : i32
    %c0_i32 = arith.constant 0 : i32
    %2 = arith.minsi %1, %c0_i32 : i32
    %c0_i32_0 = arith.constant 0 : i32
    %c0_i32_1 = arith.constant 0 : i32
    return %2, %c0_i32_0 : i32, i32
  }
  func.func @transform_1(%arg0: i32, %arg1: i32, %arg2: memref<1xf32, #tpu.memory_space<smem>>, %arg3: memref<1xi32, #tpu.memory_space<smem>>) -> (i32, i32) {
    %c1_i32 = arith.constant 1 : i32
    %0 = arith.muli %arg0, %c1_i32 : i32
    %1 = arith.addi %0, %arg1 : i32
    %c0_i32 = arith.constant 0 : i32
    %2 = arith.minsi %1, %c0_i32 : i32
    %c0_i32_0 = arith.constant 0 : i32
    %c0_i32_1 = arith.constant 0 : i32
    return %2, %c0_i32_0 : i32, i32
  }
  func.func @transform_2(%arg0: i32, %arg1: i32, %arg2: memref<1xf32, #tpu.memory_space<smem>>, %arg3: memref<1xi32, #tpu.memory_space<smem>>) -> (i32, i32, i32) {
    %c0_i32 = arith.constant 0 : i32
    %c0_i32_0 = arith.constant 0 : i32
    %c0_i32_1 = arith.constant 0 : i32
    return %arg0, %c0_i32, %c0_i32_0 : i32, i32, i32
  }
}

</mosaic_0001>

<bundles_post_ra>
// kernel: _run_sums.1
= control target key start
LH: loop header
LB: loop body
LE: loop exit
PB: predicated region body
PF: predicated region fallthrough
CT: control target
= control target key end

     0   :  { %s992_s0 = inlined_call_operand.<no memory space> [shape: f32[1], index: 0, kind: input, shape index: {}]   ;;  %s993_s1 = inlined_call_operand.<no memory space> [shape: s32[1], index: 1, kind: input, shape index: {}]   ;;  %s994_s2 = inlined_call_operand.hbm [shape: f32[16,128], index: 2, kind: input, shape index: {}]   ;;  %s995_s3 = inlined_call_operand.hbm [shape: f32[16,128], index: 3, kind: input, shape index: {}]   ;;  %s996_s4 = inlined_call_operand.vmem [shape: f32[2,8,128], index: 4, kind: output, shape index: {}]  }
   0x1   :  { %9 = sst [smem:[#allocation4]] %s992_s0 }
   0x2   :  { %10 = sst [smem:[#allocation5]] %s993_s1 }
   0x3   :  { %11 = vsyncpa [#allocation7], 0 }
   0x4   :  { %13 = vsyncpa [#allocation7 + $0x1], 0 }
   0x5   :  { %14 = vsyncpa [#allocation9], 0 }
   0x6   :  { %16 = vsyncpa [#allocation9 + $0x1], 0  ;;  %s839_s19 = smov 0   ;;  %s841_s20 = smov 0  }
   0x7   :  { %s843_s21 = smov 0   ;;  %s845_s22 = smov 0  }
   0x8   :  { %s847_s23 = smov 0  }
   0x9 LB: > { %s594_s0 = sadd.s32 4294967295, %s799_s23   ;;  %s34_s1 = sadd.s32 1, %s795_s22  ;;  %s799_s23 = sphi %s847_s23, %s22_s23   ;;  %s795_s22 = sphi %s845_s22, %s1004_s22   ;;  %s791_s21 = sphi %s843_s21, %s1003_s21   ;;  %s787_s20 = sphi %s841_s20, %s982_s20   ;;  %s783_s19 = sphi %s839_s19, %s1002_s19  }
   0xa   : > { %p36_p0 = scmp.ge.s32.totalorder %s34_s1, 2  ;;  %p780_p1 = scmp.ne.s32.totalorder %s787_s20, 0 }
   0xb   : > { %p55_p2 = scmp.eq.s32.totalorder %s799_s23, 0  ;;  %p60_p3 = scmp.ne.s32.totalorder %s787_s20, %s783_s19 }
   0xc   : > { %s1006_s1 = smov (%p36_p0, %s34_s1), 0  ;;  %p61_p4 = scmp.eq.s32.totalorder %s594_s0, 0 }
   0xd   : > { %p56_p5 = por %p780_p1, %p55_p2  ;;  %p634_p7 = scmp.lt.s32.totalorder %s799_s23, 2 }
   0xe   : > { %p869_p6 = por %p61_p4, %p60_p3  ;;  %s155_s27 = sshll.u32 %s994_s2, 4  ;;  %s156_s27 = int_to_ptr.hbm [resolvable:$true] %s155_s27 }
   0xf   : > { %s801_s28 = smov [#allocation6]   ;;  %p877_p8 = pnand %p634_p7, %p56_p5 }
  0x10   : > { %s157_s29 = sshll.u32 %s801_s28, 4  ;;  %p604_p9 = scmp.ge.s32.totalorder %s799_s23, 1  ;;  %s158_s29 = int_to_ptr.vmem [resolvable:$true] %s157_s29 }
  0x11   : > { %p190_p10 = scmp.lt.s32.totalorder %s799_s23, 3  ;;  %s688_s5 = sshra.s32 %s156_s27, 4  ;;  %s689_s5 = int_to_ptr.hbm [resolvable:$true] %s688_s5 }
  0x12   : > { %s690_s6 = scalar_lea.hbm %s689_s5, 16  ;;  %p692_p12 = pneg %p877_p8 }
  0x13   : > { %p691_p11 = scmp.ne.s32.totalorder %s689_s5, %s690_s6  ;;  %s695_s9 = scalar_lea.hbm %s994_s2, 16 }
  0x14   : > { %p697_p1 = scmp.lt.s32.totalorder %s695_s9, %s690_s6 }
  0x15   : > { %p693_p13 = pnand %p692_p12, %p691_p11 }
  0x17   : > { %p694_p0 = pneg %p693_p13 }
  0x19   : > { %p699_p2 = pnand %p697_p1, %p694_p0 }
  0x1b   : > { %702 = shalt.err (!%p699_p2)
}
  0x1c   : > { %s802_s10 = smov 128   ;;  %s803_s11 = smov 8  }
  0x1d   : > { %630 = dma.hbm_to_vmem [thread:$0]  (!%p877_p8), %s156_s27, 256, %s158_s29, [#allocation7], %s802_s10, %s802_s10, %s803_s11  }
  0x1e   : > { %p897_p3 = pnand %p604_p9, %p190_p10  ;;  %s180_s15 = sshll.u32 %s995_s3, 4  ;;  %s181_s15 = int_to_ptr.hbm [resolvable:$true] %s180_s15 }
  0x1f   : > { %s804_s16 = smov [#allocation8]   ;;  %s718_s18 = sshra.s32 %s181_s15, 4  ;;  %s719_s18 = int_to_ptr.hbm [resolvable:$true] %s718_s18 }
  0x20   : > { %s182_s17 = sshll.u32 %s804_s16, 4  ;;  %s720_s19 = scalar_lea.hbm %s719_s18, 16  ;;  %s183_s17 = int_to_ptr.vmem [resolvable:$true] %s182_s17 }
  0x21   : > { %p721_p4 = scmp.ne.s32.totalorder %s719_s18, %s720_s19  ;;  %s725_s26 = scalar_lea.hbm %s995_s3, 16 }
  0x22   : > { %p727_p9 = scmp.lt.s32.totalorder %s725_s26, %s720_s19 }
  0x23   : > { %p723_p5 = pnand %p721_p4, %p692_p12 }
  0x25   : > { %p724_p7 = pneg %p723_p5 }
  0x27   : > { %p729_p10 = pnand %p727_p9, %p724_p7 }
  0x29   : > { %732 = shalt.err (!%p729_p10)
}
  0x2a   : > { %633 = dma.hbm_to_vmem [thread:$0]  (!%p877_p8), %s181_s15, 256, %s183_s17, [#allocation9], %s802_s10, %s802_s10, %s803_s11  }
  0x2b   : > { %194 = sbr.rel (%p897_p3) target bundleno = 148 (0x94), region = 28  ;;  %s196_s27 = sand.u32 (!%p897_p3), 1, %s787_s20  }
  0x2c   : > { %s605_s28 = sshll.u32 (!%p897_p3), %s196_s27, 4  ;;  %s197_s29 = scalar_lea.sflag (!%p897_p3), [#allocation7], %s196_s27 }
  0x2d   : > { %s915_s5 = scalar_lea.vmem (!%p897_p3), [#allocation6], %s605_s28 }
  0x30   : > { %773 = dma.done.wait (%p869_p6), %s197_s29, 256  }
  0x31   : > { %775 = vsyncadd (%p869_p6), %s197_s29, 4294967040  ;;  %s207_s6 = scalar_lea.sflag [#allocation9], %s196_s27  ;;  %s921_s7 = scalar_lea.vmem [#allocation8], %s605_s28 }
  0x32   : > { %777 = dma.done.wait (%p869_p6), %s207_s6, 256  }
  0x33   : > { %779 = vsyncadd (%p869_p6), %s207_s6, 4294967040  ;;  %p244_p8 = scmp.lt.s32.totalorder %s791_s21, 1  ;;  %s608_s30 = sshll.u32 %s791_s21, 11  ;;  %v805_v0 = vmov 0.0  }
  0x34   : > { %s929_s8 = sld [smem:[#allocation4]]  ;;  %s933_s9 = sadd.s32 2048, %s608_s30  ;;  %258 = vst [vmem:[#allocation2] sm:$0xff] %v805_v0 }
  0x35   : > { %s935_s10 = sld [smem:[#allocation5]] }
  0x36   : > { %s245_s11 = scalar_select %p244_p8, %s791_s21, 1 }
  0x38   : > { %s607_s12 = sshll.u32 %s245_s11, 3 }
  0x39   : > { %s941_s14 = scalar_lea.vmem %s996_s4, %s607_s12 }
  0x3b   : > { %p609_p6 = scmp.gt.s32.totalorder %s933_s9, %s935_s10 }
  0x3d   : > { %261 = sbr.rel (%p609_p6) target bundleno = 96 (0x60), region = 44 }
  0x42   : > { %v262_v1 = vld [vmem:[%s915_s5] sm:$0xff]  ;;  %v263_v2 = vld [vmem:[%s915_s5 + $0x8] sm:$0xff]  ;;  %v274_v4 = vstv %s929_s8  ;;  %v806_v10 = vmov 0.0   ;;  %vm345_vm4 = vcmask 1040384   ;;  %vm347_vm5 = vcmask 1041408  }
  0x43   : > { %v264_v3 = vld [vmem:[%s921_s7] sm:$0xff]  ;;  %v265_v5 = vld [vmem:[%s921_s7 + $0x8] sm:$0xff]  ;;  %v272_v7 = vmul.f32 %v262_v1, %v262_v1  ;;  %v273_v8 = vmul.f32 %v263_v2, %v263_v2  ;;  %vm275_vm0 = vcmp.gt.f32.partialorder %v262_v1, %v274_v4  ;;  %vm276_vm1 = vcmp.gt.f32.partialorder %v263_v2, %v274_v4 }
  0x44   : > { %v266_v6 = vsub.f32 %v262_v1, %v264_v3  ;;  %v267_v9 = vsub.f32 %v263_v2, %v265_v5  ;;  %v610_v11 = vsel %vm275_vm0, 1.0, %v806_v10  ;;  %vm281_vm2 = vcmp.gt.f32.partialorder %v264_v3, %v274_v4 }
  0x45   : > { %v611_v14 = vsel %vm276_vm1, 1.0, %v806_v10  ;;  %vm282_vm3 = vcmp.gt.f32.partialorder %v265_v5, %v274_v4  ;;  %v612_v17 = vsel %vm281_vm2, 1.0, %v806_v10  ;;  %v305_v21 = vadd.f32 %v263_v2, %v262_v1 }
  0x46   : > { %v268_v12 = vmul.f32 %v266_v6, %v266_v6  ;;  %v270_v13 = vand.u32 2147483647, %v266_v6  ;;  %v269_v15 = vmul.f32 %v267_v9, %v267_v9  ;;  %v271_v16 = vand.u32 2147483647, %v267_v9 }
  0x47   : > { %v613_v18 = vsel %vm282_vm3, 1.0, %v806_v10  ;;  %v287_v19 = vmul.f32 %v612_v17, %v610_v11  ;;  %v313_v22 = vadd.f32 %v273_v8, %v272_v7  ;;  %v329_v25 = vadd.f32 %v611_v14, %v610_v11  ;;  %v359_v11 = vld [vmem:[#allocation2] sm:$0xff] }
  0x48   : > { %v288_v20 = vmul.f32 %v613_v18, %v611_v14  ;;  %v289_v23 = vadd.f32 %v269_v15, %v268_v12  ;;  %v297_v24 = vadd.f32 %v271_v16, %v270_v13  ;;  %v337_v26 = vadd.f32 %v613_v18, %v612_v17 }
  0x49   : > { %v306_v27 = vrot.slane %v305_v21, 4  ;;  %v314_v28 = vrot.slane %v313_v22, 4  ;;  %v330_v32 = vrot.slane %v329_v25, 4  ;;  %vm349_vm6 = vcmask 1042432  }
  0x4a   : > { %v321_v29 = vadd.f32 %v288_v20, %v287_v19  ;;  %v290_v30 = vrot.slane %v289_v23, 4  ;;  %v298_v31 = vrot.slane %v297_v24, 4  ;;  %v338_v33 = vrot.slane %v337_v26, 4 }
  0x4b   : > { %v307_v34 = vadd.f32 %v306_v27, %v305_v21  ;;  %v315_v35 = vadd.f32 %v314_v28, %v313_v22  ;;  %v331_v39 = vadd.f32 %v330_v32, %v329_v25  ;;  %vm351_vm7 = vcmask 1043456  }
  0x4c   : > { %v322_v36 = vrot.slane %v321_v29, 4  ;;  %v291_v37 = vadd.f32 %v290_v30, %v289_v23  ;;  %v299_v38 = vadd.f32 %v298_v31, %v297_v24  ;;  %v339_v40 = vadd.f32 %v338_v33, %v337_v26 }
  0x4d   : > { %v308_v41 = vrot.slane %v307_v34, 2  ;;  %v316_v42 = vrot.slane %v315_v35, 2  ;;  %v332_v46 = vrot.slane %v331_v39, 2  ;;  %vm353_vm8 = vcmask 1044480  }
  0x4e   : > { %v323_v43 = vadd.f32 %v322_v36, %v321_v29  ;;  %v292_v44 = vrot.slane %v291_v37, 2  ;;  %v300_v45 = vrot.slane %v299_v38, 2  ;;  %v340_v47 = vrot.slane %v339_v40, 2 }
  0x4f   : > { %v309_v48 = vadd.f32 %v308_v41, %v307_v34  ;;  %v317_v49 = vadd.f32 %v316_v42, %v315_v35  ;;  %v333_v53 = vadd.f32 %v332_v46, %v331_v39  ;;  %vm355_vm9 = vcmask 1045504  }
  0x50   : > { %v324_v50 = vrot.slane %v323_v43, 2  ;;  %v293_v51 = vadd.f32 %v292_v44, %v291_v37  ;;  %v301_v52 = vadd.f32 %v300_v45, %v299_v38  ;;  %v341_v54 = vadd.f32 %v340_v47, %v339_v40 }
  0x51   : > { %v310_v55 = vrot.slane %v309_v48, 1  ;;  %v318_v56 = vrot.slane %v317_v49, 1  ;;  %v334_v60 = vrot.slane %v333_v53, 1  ;;  %vm357_vm10 = vcmask 1046528  }
  0x52   : > { %v325_v57 = vadd.f32 %v324_v50, %v323_v43  ;;  %v294_v58 = vrot.slane %v293_v51, 1  ;;  %v302_v59 = vrot.slane %v301_v52, 1  ;;  %v342_v63 = vrot.slane %v341_v54, 1 }
  0x53   : > { %v311_v61 = vadd.f32 %v310_v55, %v309_v48  ;;  %v319_v2 = vadd.f32 %v318_v56, %v317_v49  ;;  %v335_v4 = vadd.f32 %v334_v60, %v333_v53 }
  0x54   : > { %v326_v62 = vrot.slane %v325_v57, 1  ;;  %v295_v0 = vadd.f32 %v294_v58, %v293_v51  ;;  %v303_v1 = vadd.f32 %v302_v59, %v301_v52  ;;  %v343_v6 = vadd.f32 %v342_v63, %v341_v54 }
  0x56   : > { %v327_v3 = vadd.f32 %v326_v62, %v325_v57  ;;  %v346_v5 = vsel %vm345_vm4, %v295_v0, %v303_v1 }
  0x57   : > { %v348_v7 = vsel %vm347_vm5, %v346_v5, %v311_v61 }
  0x58   : > { %v350_v8 = vsel %vm349_vm6, %v348_v7, %v319_v2 }
  0x59   : > { %v352_v9 = vsel %vm351_vm7, %v350_v8, %v327_v3 }
  0x5a   : > { %v354_v10 = vsel %vm353_vm8, %v352_v9, %v335_v4 }
  0x5b   : > { %v356_v12 = vsel %vm355_vm9, %v354_v10, %v343_v6 }
  0x5c   : > { %v358_v13 = vsel %vm357_vm10, %v356_v12, 0.0 }
  0x5d   : > { %v360_v14 = vadd.f32 %v359_v11, %v358_v13 }
  0x5f   : > { %361 = vst [vmem:[#allocation2] sm:$0xff] %v360_v14 }
  0x60 PF: > { %p614_p11 = scmp.le.s32.totalorder %s933_s9, %s935_s10 }
  0x61   : > { %s400_s15 = ssub.s32 (!%p614_p11), %s935_s10, %s608_s30 }
  0x62   : > { %365 = sbr.rel (%p614_p11) target bundleno = 140 (0x8c), region = 48 }
  0x67   : > { %v366_v15 = vlaneseq  ;;  %v375_v16 = vld [vmem:[%s915_s5] sm:$0xff]  ;;  %v376_v17 = vld [vmem:[%s915_s5 + $0x8] sm:$0xff]  ;;  %v387_v21 = vstv %s929_s8  ;;  %v403_v30 = vstv %s400_s15  ;;  %v807_v36 = vmov 0.0  }
  0x68   : > { %v377_v18 = vld [vmem:[%s921_s7] sm:$0xff]  ;;  %v378_v19 = vld [vmem:[%s921_s7 + $0x8] sm:$0xff]  ;;  %v385_v25 = vmul.f32 %v375_v16, %v375_v16  ;;  %vm388_vm11 = vcmp.gt.f32.partialorder %v375_v16, %v387_v21  ;;  %vm389_vm12 = vcmp.gt.f32.partialorder %v376_v17, %v387_v21  ;;  %v386_v33 = vmul.f32 %v376_v17, %v376_v17 }
  0x69   : > { %v379_v20 = vsub.f32 %v375_v16, %v377_v18  ;;  %v367_v22 = vshrl.u32 %v366_v15, 7  ;;  %v372_v23 = vand.u32 127, %v366_v15  ;;  %v380_v24 = vsub.f32 %v376_v17, %v378_v19 }
  0x6a   : > { %vm394_vm13 = vcmp.gt.f32.partialorder %v377_v18, %v387_v21  ;;  %vm395_vm14 = vcmp.gt.f32.partialorder %v378_v19, %v387_v21  ;;  %v615_v37 = vsel %vm388_vm11, 1.0, %v807_v36  ;;  %v616_v40 = vsel %vm389_vm12, 1.0, %v807_v36 }
  0x6b   : > { %v368_v26 = vadd.s32 8, %v367_v22  ;;  %v369_v27 = vmul.u32 128, %v367_v22  ;;  %v381_v28 = vmul.f32 %v379_v20, %v379_v20  ;;  %v383_v29 = vand.u32 2147483647, %v379_v20 }
  0x6c   : > { %v382_v34 = vmul.f32 %v380_v24, %v380_v24  ;;  %v384_v35 = vand.u32 2147483647, %v380_v24  ;;  %v617_v38 = vsel %vm394_vm13, 1.0, %v807_v36  ;;  %v618_v42 = vsel %vm395_vm14, 1.0, %v807_v36 }
  0x6d   : > { %v370_v31 = vmul.u32 128, %v368_v26  ;;  %v373_v32 = vadd.s32 %v372_v23, %v369_v27  ;;  %vm476_vm1 = vcmask 1040384   ;;  %vm478_vm2 = vcmask 1041408  }
  0x6e   : > { %vm480_vm3 = vcmask 1042432   ;;  %vm482_vm4 = vcmask 1043456   ;;  %vm484_vm5 = vcmask 1044480   ;;  %vm486_vm6 = vcmask 1045504  }
  0x6f   : > { %v374_v39 = vadd.s32 %v372_v23, %v370_v31  ;;  %vm960_vm15 = vcmp.lt.s32.totalorder %v373_v32, %v403_v30  ;;  %vm488_vm7 = vcmask 1046528  }
  0x70   : > { %v406_v43 = vsel %vm960_vm15, %v381_v28, 0.0  ;;  %v408_v44 = vsel %vm960_vm15, %v383_v29, 0.0  ;;  %v410_v45 = vsel %vm960_vm15, %v375_v16, 0.0  ;;  %v412_v46 = vsel %vm960_vm15, %v385_v25, 0.0 }
  0x71   : > { %vm405_vm0 = vcmp.lt.s32.totalorder %v374_v39, %v403_v30  ;;  %v414_v47 = vsel %vm960_vm15, %v615_v37, 0.0  ;;  %v416_v48 = vsel %vm960_vm15, %v617_v38, 0.0 }
  0x72   : > { %v407_v49 = vsel %vm405_vm0, %v382_v34, 0.0  ;;  %v409_v50 = vsel %vm405_vm0, %v384_v35, 0.0  ;;  %v411_v51 = vsel %vm405_vm0, %v376_v17, 0.0  ;;  %v413_v52 = vsel %vm405_vm0, %v386_v33, 0.0 }
  0x73   : > { %v415_v53 = vsel %vm405_vm0, %v616_v40, 0.0  ;;  %v417_v54 = vsel %vm405_vm0, %v618_v42, 0.0  ;;  %v418_v55 = vmul.f32 %v416_v48, %v414_v47  ;;  %v420_v56 = vadd.f32 %v407_v49, %v406_v43 }
  0x74   : > { %v419_v57 = vmul.f32 %v417_v54, %v415_v53  ;;  %v428_v58 = vadd.f32 %v409_v50, %v408_v44  ;;  %v436_v59 = vadd.f32 %v411_v51, %v410_v45  ;;  %v444_v60 = vadd.f32 %v413_v52, %v412_v46 }
  0x75   : > { %v421_v61 = vrot.slane %v420_v56, 4  ;;  %v460_v62 = vadd.f32 %v415_v53, %v414_v47  ;;  %v468_v63 = vadd.f32 %v417_v54, %v416_v48  ;;  %v490_v47 = vld [vmem:[#allocation2] sm:$0xff] }
  0x76   : > { %v429_v0 = vrot.slane %v428_v58, 4  ;;  %v437_v1 = vrot.slane %v436_v59, 4  ;;  %v445_v2 = vrot.slane %v444_v60, 4  ;;  %v452_v3 = vadd.f32 %v419_v57, %v418_v55 }
  0x77   : > { %v422_v4 = vadd.f32 %v421_v61, %v420_v56  ;;  %v461_v5 = vrot.slane %v460_v62, 4  ;;  %v469_v6 = vrot.slane %v468_v63, 4 }
  0x78   : > { %v430_v7 = vadd.f32 %v429_v0, %v428_v58  ;;  %v438_v8 = vadd.f32 %v437_v1, %v436_v59  ;;  %v446_v9 = vadd.f32 %v445_v2, %v444_v60  ;;  %v453_v10 = vrot.slane %v452_v3, 4 }
  0x79   : > { %v423_v11 = vrot.slane %v422_v4, 2  ;;  %v462_v12 = vadd.f32 %v461_v5, %v460_v62  ;;  %v470_v13 = vadd.f32 %v469_v6, %v468_v63 }
  0x7a   : > { %v431_v14 = vrot.slane %v430_v7, 2  ;;  %v439_v15 = vrot.slane %v438_v8, 2  ;;  %v447_v16 = vrot.slane %v446_v9, 2  ;;  %v454_v17 = vadd.f32 %v453_v10, %v452_v3 }
  0x7b   : > { %v424_v18 = vadd.f32 %v423_v11, %v422_v4  ;;  %v463_v19 = vrot.slane %v462_v12, 2  ;;  %v471_v20 = vrot.slane %v470_v13, 2 }
  0x7c   : > { %v432_v21 = vadd.f32 %v431_v14, %v430_v7  ;;  %v440_v22 = vadd.f32 %v439_v15, %v438_v8  ;;  %v448_v23 = vadd.f32 %v447_v16, %v446_v9  ;;  %v455_v24 = vrot.slane %v454_v17, 2 }
  0x7d   : > { %v425_v25 = vrot.slane %v424_v18, 1  ;;  %v464_v26 = vadd.f32 %v463_v19, %v462_v12  ;;  %v472_v27 = vadd.f32 %v471_v20, %v470_v13 }
  0x7e   : > { %v433_v28 = vrot.slane %v432_v21, 1  ;;  %v441_v29 = vrot.slane %v440_v22, 1  ;;  %v449_v30 = vrot.slane %v448_v23, 1  ;;  %v456_v31 = vadd.f32 %v455_v24, %v454_v17 }
  0x7f   : > { %v426_v32 = vadd.f32 %v425_v25, %v424_v18  ;;  %v465_v33 = vrot.slane %v464_v26, 1  ;;  %v473_v34 = vrot.slane %v472_v27, 1 }
  0x80   : > { %v434_v35 = vadd.f32 %v433_v28, %v432_v21  ;;  %v442_v36 = vadd.f32 %v441_v29, %v440_v22  ;;  %v450_v37 = vadd.f32 %v449_v30, %v448_v23  ;;  %v457_v38 = vrot.slane %v456_v31, 1 }
  0x81   : > { %v466_v40 = vadd.f32 %v465_v33, %v464_v26  ;;  %v474_v42 = vadd.f32 %v473_v34, %v472_v27 }
  0x82   : > { %v458_v39 = vadd.f32 %v457_v38, %v456_v31  ;;  %v477_v41 = vsel %vm476_vm1, %v426_v32, %v434_v35 }
  0x83   : > { %v479_v43 = vsel %vm478_vm2, %v477_v41, %v442_v36 }
  0x84   : > { %v481_v44 = vsel %vm480_vm3, %v479_v43, %v450_v37 }
  0x85   : > { %v483_v45 = vsel %vm482_vm4, %v481_v44, %v458_v39 }
  0x86   : > { %v485_v46 = vsel %vm484_vm5, %v483_v45, %v466_v40 }
  0x87   : > { %v487_v48 = vsel %vm486_vm6, %v485_v46, %v474_v42 }
  0x88   : > { %v489_v49 = vsel %vm488_vm7, %v487_v48, 0.0 }
  0x89   : > { %v491_v50 = vadd.f32 %v490_v47, %v489_v49 }
  0x8b   : > { %492 = vst [vmem:[#allocation2] sm:$0xff] %v491_v50 }
  0x8c PF:  {}
  0x92   : > { %v496_v51 = vld [vmem:[#allocation2] sm:$0xff] }
  0x93   : > { %497 = vst [vmem:[%s941_s14] sm:$0xff] %v496_v51 }
  0x94 PF: > { %s22_s23 = sadd.s32 1, %s799_s23   ;;  %s1002_s19 = smov %s787_s20 }
  0x95   : > { %p19_p12 = scmp.ge.s32.totalorder %s22_s23, 4   ;;  %s982_s20 = smov 0  }
  0x96   : > { %s1003_s21 = smov %s795_s22  ;;  %s1004_s22 = smov %s1006_s1 }
  0x97   :  { %21 = sbr.rel (!%p19_p12) target bundleno = 9 (0x9), region = 97 }
  0x9c   :  { %517 = vsyncpa [#allocation7], 1 }
  0x9d   :  { %519 = vsyncpa [#allocation7 + $0x1], 1 }
  0x9e   :  { %520 = vsyncpa [#allocation9], 1 }
  0x9f   :  { %522 = vsyncpa [#allocation9 + $0x1], 1 }

</bundles_post_ra>
